<compile_context>
chip_gen: v7x
topology: tpu7x:2x2x1
jax: 0.10.0
libtpu: 0.0.40
codegen_flags: <defaults>
</compile_context>

<pallas_src>
import jax
import jax.numpy as jnp
import numpy as np
from jax.experimental import pallas as pl
from jax.experimental.pallas import tpu as pltpu


def _spatial_dropout_kernel(x_ref, m_ref, o_ref):
    # x_ref: (bB, tT, tC), m_ref: (bB, 1, tC), o_ref: (bB, tT, tC)
    # Native-dtype multiply; the (bB, 1, tC) mask broadcasts over the T axis.
    o_ref[...] = x_ref[...] * m_ref[...]


def _choose_tiles(B, T, C, itemsize, target_bytes=2 << 20):
    """Pick (bB, tT, tC) so one block is ~target_bytes.

    Folds batch elements when T*C is small, tiles T (multiple of the dtype's
    sublane packing) when T*C is large, and falls back to tiling C in
    multiples of 128 when even a minimum-height block would be huge.
    """
    sub = max(8, 32 // itemsize)          # sublane packing: f32=8, bf16=16, i8=32
    row_bytes = C * itemsize

    # C-tiling fallback: even (1, sub, C) would be far past the target.
    if sub * row_bytes > 4 * target_bytes and C > 128:
        tC = ((4 * target_bytes) // (sub * itemsize)) // 128 * 128
        tC = int(min(C, max(128, tC)))
        return 1, int(min(T, sub)), tC

    batch_bytes = T * row_bytes
    if batch_bytes >= target_bytes:
        # Tile T in sublane-packed multiples.
        tT = max(sub, (target_bytes // max(1, row_bytes)) // sub * sub)
        return 1, int(min(T, tT)), C

    # Fold several batch elements per block to amortize per-step overhead,
    # but keep >= min(B, 4) grid steps so both v7x TensorCores stay busy and
    # double-buffering has something to overlap with.
    bB = int(min(B, max(1, target_bytes // max(1, batch_bytes))))
    if bB > 1:
        min_steps = min(B, 4)
        bB = min(bB, pl.cdiv(B, min_steps))
    return bB, T, C


def spatial_dropout(x, drop_prob, key, training=True):
    """JAX/Pallas equivalent of Spatial_Dropout.forward for (B, T, C) inputs.

    `drop_prob` must be a static Python float (PyTorch stores it as a module
    attribute).  `key` is a jax.random key; vary it per training step (PyTorch
    draws from the global RNG each call) or the dropout pattern is fixed.
    """
    if (not training) or drop_prob == 0.0:
        return x
    if drop_prob == 1.0:
        return jnp.zeros_like(x)

    B, T, C = x.shape
    keep = 1.0 - float(drop_prob)

    # bernoulli_(1 - p).div_(1 - p): 1/keep with prob keep, else 0; shape (B,1,C).
    bern = jax.random.bernoulli(key, keep, (B, 1, C))
    mask = jnp.where(bern, jnp.float32(1.0 / keep), jnp.float32(0.0)).astype(x.dtype)

    # Lane-density fold: pack k consecutive time-steps into the channel axis so
    # the last dim is a full 128 lanes (only when it divides cleanly).
    k = 1
    if C < 128 and 128 % C == 0:
        kk = 128 // C
        if T % kk == 0:
            k = kk
    if k > 1:
        x2 = x.reshape(B, T // k, k * C)
        mask2 = jnp.tile(mask, (1, 1, k))
    else:
        x2, mask2 = x, mask
    B2, T2, C2 = x2.shape

    itemsize = jnp.dtype(x.dtype).itemsize
    bB, tT, tC = _choose_tiles(B2, T2, C2, itemsize)

    # Grid order (b, c, t): t innermost keeps the mask block index constant
    # across the fastest-varying axis, so Pallas skips its re-DMA.
    grid = (pl.cdiv(B2, bB), pl.cdiv(C2, tC), pl.cdiv(T2, tT))

    block_bytes = bB * tT * tC * itemsize
    mask_bytes = bB * tC * itemsize
    # Double-buffered (in + out) blocks + double-buffered mask + slack.
    vmem_limit = int(min(64 << 20,
                         max(16 << 20, 4 * block_bytes + 2 * mask_bytes + (4 << 20))))

    out2 = pl.pallas_call(
        _spatial_dropout_kernel,
        out_shape=jax.ShapeDtypeStruct((B2, T2, C2), x.dtype),
        grid=grid,
        in_specs=[
            pl.BlockSpec((bB, tT, tC), lambda b, c, t: (b, t, c)),
            pl.BlockSpec((bB, 1, tC), lambda b, c, t: (b, 0, c)),
        ],
        out_specs=pl.BlockSpec((bB, tT, tC), lambda b, c, t: (b, t, c)),
        compiler_params=pltpu.CompilerParams(
            dimension_semantics=("parallel", "parallel", "parallel"),
            vmem_limit_bytes=vmem_limit),
        cost_estimate=pl.CostEstimate(
            flops=B * T * C,
            transcendentals=0,
            bytes_accessed=2 * B * T * C * itemsize + B * C * itemsize),
    )(x2, mask2)

    return out2.reshape(B, T, C) if k > 1 else out2


if __name__ == "__main__":
    key = jax.random.PRNGKey(0)
    kx, kmask = jax.random.split(key)

    B, T, C = 2, 8, 32          # batch=2, seq=8, hidden/channels=32
    x = jax.random.normal(kx, (B, T, C), dtype=jnp.float32)
    drop_prob = 0.5

    # training-mode path (the kernel)
    out = jax.block_until_ready(spatial_dropout(x, drop_prob, kmask, training=True))

    # Sanity checks: every output element is either 0 (dropped channel) or the
    # input scaled by 1/keep_prob, and the drop decision is constant over T.
    xn, on = np.asarray(x), np.asarray(out)
    keep = 1.0 - drop_prob
    scaled = xn / keep
    is_zero = np.abs(on) < 1e-6
    is_scaled = np.abs(on - scaled) < 1e-4 * (1.0 + np.abs(scaled))
    assert np.all(is_zero | is_scaled), "output not in {0, x/keep_prob}"
    dropped = is_zero & (np.abs(xn) > 1e-6)
    kept = is_scaled & (np.abs(xn) > 1e-6)
    for b in range(B):
        for c in range(C):
            col_d, col_k = dropped[b, :, c], kept[b, :, c]
            assert not (col_d.any() and col_k.any()), "mask varies over T"

    # eval-mode path is identity
    out_eval = jax.block_until_ready(
        spatial_dropout(x, drop_prob, kmask, training=False))
    assert np.allclose(np.asarray(out_eval), xn)

    # drop_prob == 1 zeros everything
    out_p1 = jax.block_until_ready(spatial_dropout(x, 1.0, kmask, training=True))
    assert np.all(np.asarray(out_p1) == 0.0)

    print("KERNEL_OK")
</pallas_src>

<mosaic_0001>
module attributes {stable_mosaic.version = 11 : i64} {
  func.func @_spatial_dropout_kernel(%arg0: i32, %arg1: i32, %arg2: i32, %arg3: memref<1x2x128xf32, #tpu.memory_space<vmem>>, %arg4: memref<1x1x128xf32, #tpu.memory_space<vmem>>, %arg5: memref<1x2x128xf32, #tpu.memory_space<vmem>>) attributes {dimension_semantics = [#tpu.dimension_semantics<parallel>, #tpu.dimension_semantics<parallel>, #tpu.dimension_semantics<parallel>], iteration_bounds = array<i64: 2, 1, 1>, scalar_prefetch = 0 : i64, scratch_operands = 0 : i64, tpu.core_type = #tpu.core_type<tc>, window_params = [{transform_indices = @transform_0, window_bounds = array<i64: 1, 2, 128>}, {transform_indices = @transform_1, window_bounds = array<i64: 1, 1, 128>}, {transform_indices = @transform_2, window_bounds = array<i64: 1, 2, 128>}]} {
    %c0 = arith.constant 0 : index
    %c0_0 = arith.constant 0 : index
    %c0_1 = arith.constant 0 : index
    %0 = vector.load %arg3[%c0, %c0_0, %c0_1] : memref<1x2x128xf32, #tpu.memory_space<vmem>>, vector<1x2x128xf32>
    %c0_2 = arith.constant 0 : index
    %c0_3 = arith.constant 0 : index
    %c0_4 = arith.constant 0 : index
    %1 = vector.load %arg4[%c0_2, %c0_3, %c0_4] : memref<1x1x128xf32, #tpu.memory_space<vmem>>, vector<1x1x128xf32>
    %2 = vector.broadcast %1 : vector<1x1x128xf32> to vector<1x2x128xf32>
    %3 = arith.mulf %0, %2 : vector<1x2x128xf32>
    %c0_5 = arith.constant 0 : index
    %c0_6 = arith.constant 0 : index
    %c0_7 = arith.constant 0 : index
    %4 = vector.load %arg5[%c0_5, %c0_6, %c0_7] : memref<1x2x128xf32, #tpu.memory_space<vmem>>, vector<1x2x128xf32>
    tpu.vector_store %arg5[%c0_5, %c0_6, %c0_7], %3 {strides = array<i32>} : memref<1x2x128xf32, #tpu.memory_space<vmem>>, vector<1x2x128xf32>,
    return
  }
  func.func @transform_0(%arg0: i32, %arg1: i32, %arg2: i32) -> (i32, i32, i32) {
    %c0_i32 = arith.constant 0 : i32
    return %arg0, %arg2, %arg1 : i32, i32, i32
  }
  func.func @transform_1(%arg0: i32, %arg1: i32, %arg2: i32) -> (i32, i32, i32) {
    %c0_i32 = arith.constant 0 : i32
    %c0_i32_0 = arith.constant 0 : i32
    return %arg0, %c0_i32, %arg1 : i32, i32, i32
  }
  func.func @transform_2(%arg0: i32, %arg1: i32, %arg2: i32) -> (i32, i32, i32) {
    %c0_i32 = arith.constant 0 : i32
    return %arg0, %arg2, %arg1 : i32, i32, i32
  }
}

</mosaic_0001>

<bundles_post_ra>
// kernel: tpu_custom_call.1
= control target key start
LH: loop header
LB: loop body
LE: loop exit
PB: predicated region body
PF: predicated region fallthrough
CT: control target
= control target key end

     0   :  { %7 = vsyncpa [#allocation3], 0  ;;  %s720_s0 = inlined_call_operand.hbm [shape: f32[2,2,128], index: 0, kind: input, shape index: {}]   ;;  %s721_s1 = inlined_call_operand.vmem [shape: f32[2,1,128], index: 1, kind: input, shape index: {}]   ;;  %s722_s2 = inlined_call_operand.hbm [shape: f32[2,2,128], index: 2, kind: output, shape index: {}]  }
   0x1   :  { %9 = vsyncpa [#allocation3 + $0x1], 0 }
   0x2   :  { %10 = vsyncpa [#allocation4], 0 }
   0x3   :  { %12 = vsyncpa [#allocation4 + $0x1], 0  ;;  %s543_s9 = smov 0   ;;  %s545_s10 = smov 0  }
   0x4   :  { %s547_s11 = smov 0   ;;  %s549_s12 = smov 0  }
   0x5   :  { %s551_s13 = smov 0   ;;  %s553_s14 = smov 0  }
   0x6 LB: > { %s336_s15 = sadd.s32 4294967295, %s524_s14   ;;  %s337_s16 = sadd.s32 4294967294, %s524_s14   ;;  %s524_s14 = sphi %s553_s14, %s18_s14   ;;  %s520_s13 = sphi %s551_s13, %s738_s13   ;;  %s516_s12 = sphi %s549_s12, %s737_s12   ;;  %s512_s11 = sphi %s547_s11, %s736_s11   ;;  %s508_s10 = sphi %s545_s10, %s735_s10   ;;  %s504_s9 = sphi %s543_s9, %s734_s9  }
   0x7   : > { %s37_s17 = sadd.s32 1, %s520_s13  ;;  %s48_s18 = sadd.s32 1, %s512_s11 }
   0x8   : > { %p39_p0 = scmp.ge.s32.totalorder %s37_s17, 2  ;;  %p55_p1 = scmp.ne.s32.totalorder %s512_s11, %s508_s10 }
   0x9   : > { %p56_p2 = scmp.eq.s32.totalorder %s524_s14, 0  ;;  %p61_p3 = scmp.ne.s32.totalorder %s508_s10, %s504_s9 }
   0xa   : > { %s740_s17 = smov (%p39_p0, %s37_s17), 0  ;;  %p62_p5 = scmp.eq.s32.totalorder %s336_s15, 0 }
   0xb   : > { %p584_p4 = por %p56_p2, %p55_p1  ;;  %s41_s20 = ssub.s32 %s520_s13, %s740_s17 }
   0xc   : > { %p117_p6 = scmp.eq.s32.totalorder %s336_s15, 1  ;;  %p46_p7 = scmp.eq.s32.totalorder %s41_s20, 0 }
   0xd   : > { %p590_p8 = por %p62_p5, %p61_p3  ;;  %p123_p10 = scmp.eq.s32.totalorder %s337_s16, 1 }
   0xe   : > { %p594_p9 = por %p117_p6, %p55_p1  ;;  %p362_p13 = scmp.lt.s32.totalorder %s524_s14, 2 }
   0xf   : > { %s599_s23 = scalar_select %p46_p7, %s512_s11, %s48_s18  }
  0x10   : > { %s726_s22 = scalar_select %p594_p9, 1, 0 }
  0x11   : > { %p601_p11 = por %p123_p10, %p61_p3  ;;  %s143_s25 = sand.u32 1, %s512_s11  }
  0x12   : > { %s340_s26 = sshll.u32 %s143_s25, 1  ;;  %s341_s27 = sshll.u32 %s520_s13, 5 }
  0x13   : > { %s727_s24 = scalar_select %p601_p11, 1, 0 }
  0x14   : > { %s612_s30 = scalar_lea.hbm %s720_s0, %s341_s27  ;;  %s147_s3 = scalar_lea.vmem [#allocation2], %s340_s26 }
  0x15   : > { %s156_s4 = sshll.u32 %s147_s3, 4  ;;  %p618_p0 = pnand %p362_p13, %p584_p4  ;;  %s614_s4 = int_to_ptr.vmem [resolvable:$true] %s156_s4 }
  0x16   : > { %s144_s6 = scalar_lea.sflag [#allocation3], %s143_s25  ;;  %s412_s7 = scalar_lea.hbm %s612_s30, 32 }
  0x17   : > { %p413_p3 = scmp.ne.s32.totalorder %s612_s30, %s412_s7  ;;  %p414_p5 = pneg %p618_p0 }
  0x18   : > { %s417_s16 = scalar_lea.hbm %s720_s0, 64  ;;  %p418_p4 = scmp.lt.u32.totalorder %s612_s30, %s720_s0 }
  0x19   : > { %p415_p6 = pnand %p414_p5, %p413_p3  ;;  %p419_p10 = scmp.lt.u32.totalorder %s417_s16, %s412_s7 }
  0x1a   : > { %p421_p12 = scmp.lt.u32.totalorder %s412_s7, %s612_s30 }
  0x1b   : > { %p416_p7 = pneg %p415_p6  ;;  %p420_p13 = por %p419_p10, %p418_p4 }
  0x1d   : > { %p422_p1 = por %p421_p12, %p420_p13 }
  0x1f   : > { %p423_p2 = pnand %p422_p1, %p416_p7 }
  0x21   : > { %426 = shalt.err (!%p423_p2)
}
  0x22   : > { %s427_s20 = scalar_lea.vmem %s614_s4, 32  ;;  %s526_s25 = smov [#allocation2]  }
  0x23   : > { %p428_p3 = scmp.ne.s32.totalorder %s614_s4, %s427_s20  ;;  %s432_s26 = sshll.u32 %s526_s25, 4  ;;  %s433_s26 = int_to_ptr.vmem [resolvable:$false] %s432_s26 }
  0x24   : > { %s434_s27 = scalar_lea.vmem %s433_s26, 64  ;;  %p435_p9 = scmp.lt.s32.totalorder %s614_s4, %s433_s26 }
  0x25   : > { %p430_p6 = pnand %p428_p3, %p414_p5  ;;  %p436_p4 = scmp.lt.s32.totalorder %s434_s27, %s427_s20 }
  0x27   : > { %p431_p11 = pneg %p430_p6  ;;  %p437_p10 = por %p436_p4, %p435_p9 }
  0x29   : > { %p438_p12 = pnand %p437_p10, %p431_p11 }
  0x2b   : > { %441 = shalt.err (!%p438_p12)
}
  0x2c   : > { %357 = dma.hbm_to_vmem [thread:$0]  (!%p618_p0), %s612_s30, 32, %s614_s4, %s144_s6  }
  0x2d   : > { %p729_p1 = scmp.lt.s32.totalorder %s524_s14, 3  ;;  %p730_p2 = scmp.ge.s32.totalorder %s524_s14, 1 }
  0x2f   : > { %p171_p5 = pnand %p730_p2, %p729_p1 }
  0x30   : > { %s654_s28 = sand.u32 (!%p171_p5), 1, %s508_s10  }
  0x31   : > { %174 = sbr.rel (%p171_p5) target bundleno = 85 (0x55), region = 28  ;;  %s343_s29 = sshll.u32 (!%p171_p5), %s654_s28, 1 }
  0x32   : > { %s177_s3 = scalar_lea.sflag (!%p171_p5), [#allocation3], %s654_s28  ;;  %s180_s7 = scalar_lea.vmem (!%p171_p5), [#allocation2], %s343_s29 }
  0x38   : > { %495 = dma.done.wait (%p590_p8), %s177_s3, 32  }
  0x39   : > { %497 = vsyncadd (%p590_p8), %s177_s3, 4294967264  ;;  %p207_p9 = scmp.lt.s32.totalorder %s516_s12, 1  ;;  %s206_s8 = scalar_lea.vmem [#allocation5], %s343_s29  ;;  %v213_v0 = vld [vmem:[%s180_s7] sm:$0x3] }
  0x3a   : > { %s239_s15 = sshll.u32 %s206_s8, 4  ;;  %s347_s16 = sshll.u32 %s516_s12, 5  ;;  %s668_s15 = int_to_ptr.vmem [resolvable:$true] %s239_s15 }
  0x3b   : > { %s208_s30 = scalar_select %p207_p9, %s516_s12, 1 }
  0x3c   : > { %s673_s19 = scalar_lea.hbm %s722_s2, %s347_s16  ;;  %s224_s20 = scalar_lea.sflag [#allocation4], %s654_s28 }
  0x3d   : > { %s212_s6 = scalar_lea.vmem %s721_s1, %s208_s30  ;;  %s442_s25 = scalar_lea.vmem %s668_s15, 32 }
  0x3e   : > { %v345_v1 = vld [vmem:[%s212_s6] ss:$0 sm:$0xff]  ;;  %p443_p8 = scmp.ne.s32.totalorder %s668_s15, %s442_s25  ;;  %p731_p11 = scmp.ne.s32.totalorder %s726_s22, 0 }
  0x3f   : > { %v221_v2 = vmul.f32 %v345_v1, %v213_v0  ;;  %s527_s12 = smov [#allocation5]  }
  0x40   : > { %p444_p0 = pnand %p443_p8, %p731_p11  ;;  %s446_s26 = sshll.u32 %s527_s12, 4  ;;  %s447_s26 = int_to_ptr.vmem [resolvable:$false] %s446_s26 }
  0x41   : > { %222 = vst [vmem:[%s206_s8] sm:$0x3] %v221_v2  ;;  %s448_s27 = scalar_lea.vmem %s447_s26, 64  ;;  %p449_p13 = scmp.lt.s32.totalorder %s668_s15, %s447_s26 }
  0x42   : > { %p445_p7 = pneg %p444_p0  ;;  %p450_p3 = scmp.lt.s32.totalorder %s448_s27, %s442_s25 }
  0x44   : > { %p451_p6 = por %p450_p3, %p449_p13 }
  0x46   : > { %p452_p4 = pnand %p451_p6, %p445_p7 }
  0x48   : > { %455 = shalt.err (!%p452_p4)
}
  0x49   : > { %s456_s28 = scalar_lea.hbm %s673_s19, 32  ;;  %s460_s7 = scalar_lea.hbm %s722_s2, 64 }
  0x4a   : > { %p457_p10 = scmp.ne.s32.totalorder %s673_s19, %s456_s28  ;;  %p461_p2 = scmp.lt.u32.totalorder %s673_s19, %s722_s2 }
  0x4b   : > { %p462_p5 = scmp.lt.u32.totalorder %s460_s7, %s456_s28  ;;  %p464_p8 = scmp.lt.u32.totalorder %s456_s28, %s673_s19 }
  0x4c   : > { %p458_p12 = pnand %p457_p10, %p731_p11 }
  0x4d   : > { %p463_p9 = por %p462_p5, %p461_p2 }
  0x4e   : > { %p459_p1 = pneg %p458_p12 }
  0x4f   : > { %p465_p0 = por %p464_p8, %p463_p9 }
  0x51   : > { %p466_p7 = pnand %p465_p0, %p459_p1 }
  0x53   : > { %469 = shalt.err (!%p466_p7)
}
  0x54   : > { %352 = dma.vmem_to_hbm [thread:$0]  (%p731_p11), %s668_s15, 32, %s673_s19, %s224_s20  }
  0x55 PF: > { %s251_s5 = sand.u32 1, %s504_s9   ;;  %p732_p13 = scmp.ne.s32.totalorder %s727_s24, 0 }
  0x56   : > { %p733_p3 = scmp.ge.s32.totalorder %s524_s14, 2  ;;  %s252_s6 = scalar_lea.sflag [#allocation4], %s251_s5 }
  0x58   : > { %p359_p6 = pnand %p733_p3, %p732_p13 }
  0x5a   : > { %499 = dma.done.wait (!%p359_p6), %s252_s6, 32  }
  0x5b   : > { %501 = vsyncadd (!%p359_p6), %s252_s6, 4294967264  ;;  %s18_s14 = sadd.s32 1, %s524_s14   ;;  %s734_s9 = smov %s508_s10 }
  0x5c   : > { %p15_p4 = scmp.ge.s32.totalorder %s18_s14, 4   ;;  %s735_s10 = smov %s512_s11 }
  0x5d   : > { %s736_s11 = smov %s599_s23  ;;  %s737_s12 = smov %s520_s13 }
  0x5e   : > { %s738_s13 = smov %s740_s17  ;;  %17 = sbr.rel (!%p15_p4) target bundleno = 6 (0x6), region = 76 }
  0x65   :  { %257 = vsyncpa [#allocation3], 1 }
  0x66   :  { %259 = vsyncpa [#allocation3 + $0x1], 1 }
  0x67   :  { %260 = vsyncpa [#allocation4], 1 }
  0x68   :  { %262 = vsyncpa [#allocation4 + $0x1], 1 }

</bundles_post_ra>
